<compile_context>
chip_gen: v5e
topology: v5e:2x2
jax: 0.10.0
libtpu: 0.0.40
codegen_flags: <defaults>
</compile_context>

<pallas_src>
import functools

import numpy as np
import jax
import jax.numpy as jnp
from jax.experimental import pallas as pl
from jax.experimental.pallas import tpu as pltpu

LANE = 128            # TPU lane width; every layer is zero-padded to 128 cols.
BATCH_BLOCK = 256     # batch tile when a grid is used (v7x: 2 TCs).
GRID_MIN_BATCH = 512  # below this a grid only adds per-step overhead.


# --------------------------------------------------------------------------
# Parameter packing (host-side, done once per weight update)
# --------------------------------------------------------------------------
def pack_params(params, dtype=jnp.float32):
    """Fold weights+biases into a zero-padded slab [L, 128, 128].

    Layer i's weights occupy rows [0:K_i], its bias lives in row K_i, and the
    activation carries a constant 1.0 in lane K_i, so every layer is a pure
    128x128 MXU matmul.  A 1.0 is also planted at
    slab[i, K_i, K_{i+1}] so the bias lane self-propagates through the
    matmul + ReLU chain (no in-kernel where-plant needed).
    """
    n_layers = len(params)
    slab = np.zeros((n_layers, LANE, LANE), np.float32)
    bias_rows = []
    for i, (w, b) in enumerate(params):
        k, n = w.shape
        assert k < LANE, "layer input width must be <= 127 so its bias lane fits"
        assert n <= LANE and (i == n_layers - 1 or n < LANE), \
            "hidden width must be <= 127 so the carried bias lane fits"
        slab[i, :k, :n] = np.asarray(w, np.float32)
        slab[i, k, :n] = np.asarray(b, np.float32).reshape(-1)
        bias_rows.append(k)
    # Self-propagating bias carry: the input activation of layer i holds 1.0 in
    # lane bias_rows[i]; route it into column bias_rows[i+1] (a zero-padded
    # output column of layer i) so layer i+1's bias row is pre-multiplied by 1.
    for i in range(n_layers - 1):
        next_row = params[i + 1][0].shape[0]  # == true output width of layer i
        slab[i, bias_rows[i], next_row] = 1.0
    return jnp.asarray(slab, dtype), tuple(bias_rows)


# --------------------------------------------------------------------------
# Kernel
# --------------------------------------------------------------------------
def _make_dqn_kernel(n_layers, n_actions, with_argmax):
    def kernel(x_ref, w_ref, q_ref, *rest):
        wdt = w_ref.dtype
        h = x_ref[...]                               # (Bt, 128), f32
        for i in range(n_layers):
            h = jnp.dot(h.astype(wdt), w_ref[i],
                        preferred_element_type=jnp.float32)
            if i < n_layers - 1:
                h = jnp.maximum(h, 0.0)              # f32 elementwise (v5e-safe)
        # Lane-dense Q output (padded columns are exact zeros / bias-carry lane).
        q_ref[...] = h.astype(q_ref.dtype)
        if with_argmax:
            a_ref = rest[0]
            lane = jax.lax.broadcasted_iota(jnp.int32, h.shape, 1)
            q_m = jnp.where(lane < n_actions, h, -jnp.inf)
            q_max = jnp.max(q_m, axis=-1, keepdims=True)
            first = jnp.min(jnp.where(q_m == q_max, lane, LANE),
                            axis=-1, keepdims=True)  # first-max tie-break
            a_ref[...] = first.astype(jnp.int32)

    return kernel


def _dqn_pallas_call(x_pad, w_slab, *, n_actions, with_argmax):
    batch = x_pad.shape[0]
    n_layers = w_slab.shape[0]
    kernel = _make_dqn_kernel(n_layers, n_actions, with_argmax)

    q_shape = jax.ShapeDtypeStruct((batch, LANE), jnp.float32)
    a_shape = jax.ShapeDtypeStruct((batch, 1), jnp.int32)
    out_shape = (q_shape, a_shape) if with_argmax else q_shape

    cost = pl.CostEstimate(
        flops=2 * batch * LANE * LANE * n_layers,
        transcendentals=0,
        bytes_accessed=(4 * batch * LANE * 2
                        + w_slab.size * w_slab.dtype.itemsize
                        + 4 * batch),
    )

    use_grid = batch >= GRID_MIN_BATCH and batch % BATCH_BLOCK == 0
    if not use_grid:
        # Gridless: whole arrays resident in VMEM (tens of KiB), one TC.
        vmem = pl.BlockSpec(memory_space=pltpu.MemorySpace.VMEM)
        out_specs = (vmem, vmem) if with_argmax else vmem
        return pl.pallas_call(
            kernel, out_shape=out_shape,
            in_specs=[vmem, vmem], out_specs=out_specs,
            cost_estimate=cost,
        )(x_pad, w_slab)

    # Parallel batch grid (v7x: sharded across both TensorCores).
    x_spec = pl.BlockSpec((BATCH_BLOCK, LANE), lambda i: (i, 0))
    w_spec = pl.BlockSpec((n_layers, LANE, LANE), lambda i: (0, 0, 0))
    q_spec = pl.BlockSpec((BATCH_BLOCK, LANE), lambda i: (i, 0))
    a_spec = pl.BlockSpec((BATCH_BLOCK, 1), lambda i: (i, 0))
    out_specs = (q_spec, a_spec) if with_argmax else q_spec
    return pl.pallas_call(
        kernel, out_shape=out_shape,
        grid=(batch // BATCH_BLOCK,),
        in_specs=[x_spec, w_spec], out_specs=out_specs,
        compiler_params=pltpu.CompilerParams(
            dimension_semantics=("parallel",)),
        cost_estimate=cost,
    )(x_pad, w_slab)


# --------------------------------------------------------------------------
# Jitted end-to-end forward (pad + kernel + slice = one dispatch)
# --------------------------------------------------------------------------
@functools.partial(jax.jit,
                   static_argnames=("n_actions", "bias_row0", "with_argmax"))
def _dqn_forward(x, w_slab, *, n_actions, bias_row0, with_argmax):
    b, d = x.shape
    pb = b
    if b >= GRID_MIN_BATCH:                      # static (trace-time) decision
        pb = ((b + BATCH_BLOCK - 1) // BATCH_BLOCK) * BATCH_BLOCK
    x_pad = jnp.zeros((pb, LANE), jnp.float32)
    x_pad = x_pad.at[:b, :d].set(x.astype(jnp.float32))
    x_pad = x_pad.at[:, bias_row0].set(1.0)      # constant-1 bias lane
    out = _dqn_pallas_call(x_pad, w_slab,
                           n_actions=n_actions, with_argmax=with_argmax)
    if with_argmax:
        q_pad, actions = out
        return q_pad[:b, :n_actions], actions[:b, 0]
    return out[:b, :n_actions]


class DQNPallas:
    """Acrobot DQN (Linear->ReLU x3 -> Linear) as one Pallas TPU kernel.

    Parameters are packed once at construction (hoisted out of the per-call
    path). compute_dtype=jnp.bfloat16 cuts MXU passes / slab DMA on v6e/v7x
    while elementwise work stays f32 (v5e-safe)."""

    def __init__(self, params, compute_dtype=jnp.float32):
        self.n_actions = int(params[-1][0].shape[1])
        self.w_slab, self.bias_rows = pack_params(params, compute_dtype)

    def q_values(self, x):
        """Training path: Q-values only (no fused argmax, no extra output)."""
        return _dqn_forward(x, self.w_slab, n_actions=self.n_actions,
                            bias_row0=self.bias_rows[0], with_argmax=False)

    def act(self, x):
        """Inference path: Q-values + fused greedy action selection."""
        return _dqn_forward(x, self.w_slab, n_actions=self.n_actions,
                            bias_row0=self.bias_rows[0], with_argmax=True)


# --------------------------------------------------------------------------
# Reference / init / test driver
# --------------------------------------------------------------------------
def init_params(key, input_dim, n_actions):
    """Deterministic PyTorch-style (uniform +/- 1/sqrt(fan_in)) init."""
    dims = [(input_dim, 64), (64, 64), (64, 32), (32, n_actions)]
    params = []
    for fan_in, fan_out in dims:
        key, kw, kb = jax.random.split(key, 3)
        bound = 1.0 / jnp.sqrt(jnp.float32(fan_in))
        w = jax.random.uniform(kw, (fan_in, fan_out), jnp.float32, -bound, bound)
        b = jax.random.uniform(kb, (fan_out,), jnp.float32, -bound, bound)
        params.append((w, b))
    return params


def dqn_reference(x, params):
    h = x
    for i, (w, b) in enumerate(params):
        h = h @ w + b.reshape(1, -1)
        if i < len(params) - 1:
            h = jnp.maximum(h, 0.0)
    return h


if __name__ == "__main__":
    key = jax.random.PRNGKey(0)
    key_x, key_p, key_x2 = jax.random.split(key, 3)

    B = 128          # replay-batch sized to amortize dispatch overhead
    INPUT_DIM = 6    # Acrobot state dimension
    N_ACTIONS = 3    # Acrobot action space

    params = init_params(key_p, INPUT_DIM, N_ACTIONS)
    x = jax.random.normal(key_x, (B, INPUT_DIM), dtype=jnp.float32)
    ref = dqn_reference(x, params)

    # --- f32 path (exact parity), gridless, B=128 ---
    model = DQNPallas(params, compute_dtype=jnp.float32)
    q_train = model.q_values(x)                  # training path (no argmax)
    q_inf, actions = model.act(x)                # inference path (fused argmax)
    jax.block_until_ready((q_train, q_inf, actions))
    assert q_train.shape == (B, N_ACTIONS) and q_inf.shape == (B, N_ACTIONS)
    assert actions.shape == (B,)
    assert jnp.allclose(q_train, ref, atol=1e-4, rtol=1e-4), "Q mismatch (train)"
    assert jnp.allclose(q_inf, ref, atol=1e-4, rtol=1e-4), "Q mismatch (act)"
    assert jnp.array_equal(actions, jnp.argmax(q_inf, axis=1)), "argmax mismatch"

    # --- bf16-operand path (v6e/v7x MXU/DMA win), looser parity ---
    model_bf16 = DQNPallas(params, compute_dtype=jnp.bfloat16)
    q_b, a_b = model_bf16.act(x)
    jax.block_until_ready((q_b, a_b))
    assert jnp.allclose(q_b, ref, atol=5e-2, rtol=5e-2), "bf16 Q diverged"
    assert jnp.array_equal(a_b, jnp.argmax(q_b, axis=1)), "bf16 argmax mismatch"

    # --- large-batch grid path (parallel batch axis, v7x 2-TC) ---
    BG = 512
    xg = jax.random.normal(key_x2, (BG, INPUT_DIM), dtype=jnp.float32)
    qg = model.q_values(xg)
    jax.block_until_ready(qg)
    assert qg.shape == (BG, N_ACTIONS)
    assert jnp.allclose(qg, dqn_reference(xg, params), atol=1e-4, rtol=1e-4), \
        "Q mismatch (grid path)"

    print("KERNEL_OK")
</pallas_src>

<mosaic_0001>
module attributes {stable_mosaic.version = 11 : i64} {
  func.func @kernel(%arg0: memref<128x128xf32, #tpu.memory_space<vmem>>, %arg1: memref<4x128x128xf32, #tpu.memory_space<vmem>>, %arg2: memref<128x128xf32, #tpu.memory_space<vmem>>) attributes {dimension_semantics = [], scalar_prefetch = 0 : i64, scratch_operands = 0 : i64, tpu.core_type = #tpu.core_type<tc>} {
    %c0 = arith.constant 0 : index
    %c0_0 = arith.constant 0 : index
    %0 = vector.load %arg0[%c0, %c0_0] : memref<128x128xf32, #tpu.memory_space<vmem>>, vector<128x128xf32>
    %c0_1 = arith.constant 0 : index
    %c0_2 = arith.constant 0 : index
    %c0_3 = arith.constant 0 : index
    %1 = vector.load %arg1[%c0_1, %c0_2, %c0_3] : memref<4x128x128xf32, #tpu.memory_space<vmem>>, vector<1x128x128xf32>
    %2 = vector.shape_cast %1 : vector<1x128x128xf32> to vector<128x128xf32>
    %cst = arith.constant dense<0.000000e+00> : vector<128x128xf32>
    %3 = tpu.matmul %0, %2, %cst {dimension_numbers = #tpu.dot_dimension_numbers<[1], [0], [0], [1], [0, 0, 1, 1], [], []>} : vector<128x128xf32>, vector<128x128xf32>, vector<128x128xf32> -> vector<128x128xf32>
    %cst_4 = arith.constant 0.000000e+00 : f32
    %4 = vector.broadcast %cst_4 : f32 to vector<128x128xf32>
    %5 = arith.maximumf %3, %4 : vector<128x128xf32>
    %c1 = arith.constant 1 : index
    %c0_5 = arith.constant 0 : index
    %c0_6 = arith.constant 0 : index
    %6 = vector.load %arg1[%c1, %c0_5, %c0_6] : memref<4x128x128xf32, #tpu.memory_space<vmem>>, vector<1x128x128xf32>
    %7 = vector.shape_cast %6 : vector<1x128x128xf32> to vector<128x128xf32>
    %cst_7 = arith.constant dense<0.000000e+00> : vector<128x128xf32>
    %8 = tpu.matmul %5, %7, %cst_7 {dimension_numbers = #tpu.dot_dimension_numbers<[1], [0], [0], [1], [0, 0, 1, 1], [], []>} : vector<128x128xf32>, vector<128x128xf32>, vector<128x128xf32> -> vector<128x128xf32>
    %cst_8 = arith.constant 0.000000e+00 : f32
    %9 = vector.broadcast %cst_8 : f32 to vector<128x128xf32>
    %10 = arith.maximumf %8, %9 : vector<128x128xf32>
    %c2 = arith.constant 2 : index
    %c0_9 = arith.constant 0 : index
    %c0_10 = arith.constant 0 : index
    %11 = vector.load %arg1[%c2, %c0_9, %c0_10] : memref<4x128x128xf32, #tpu.memory_space<vmem>>, vector<1x128x128xf32>
    %12 = vector.shape_cast %11 : vector<1x128x128xf32> to vector<128x128xf32>
    %cst_11 = arith.constant dense<0.000000e+00> : vector<128x128xf32>
    %13 = tpu.matmul %10, %12, %cst_11 {dimension_numbers = #tpu.dot_dimension_numbers<[1], [0], [0], [1], [0, 0, 1, 1], [], []>} : vector<128x128xf32>, vector<128x128xf32>, vector<128x128xf32> -> vector<128x128xf32>
    %cst_12 = arith.constant 0.000000e+00 : f32
    %14 = vector.broadcast %cst_12 : f32 to vector<128x128xf32>
    %15 = arith.maximumf %13, %14 : vector<128x128xf32>
    %c3 = arith.constant 3 : index
    %c0_13 = arith.constant 0 : index
    %c0_14 = arith.constant 0 : index
    %16 = vector.load %arg1[%c3, %c0_13, %c0_14] : memref<4x128x128xf32, #tpu.memory_space<vmem>>, vector<1x128x128xf32>
    %17 = vector.shape_cast %16 : vector<1x128x128xf32> to vector<128x128xf32>
    %cst_15 = arith.constant dense<0.000000e+00> : vector<128x128xf32>
    %18 = tpu.matmul %15, %17, %cst_15 {dimension_numbers = #tpu.dot_dimension_numbers<[1], [0], [0], [1], [0, 0, 1, 1], [], []>} : vector<128x128xf32>, vector<128x128xf32>, vector<128x128xf32> -> vector<128x128xf32>
    %c0_16 = arith.constant 0 : index
    %c0_17 = arith.constant 0 : index
    %19 = vector.load %arg2[%c0_16, %c0_17] : memref<128x128xf32, #tpu.memory_space<vmem>>, vector<128x128xf32>
    tpu.vector_store %arg2[%c0_16, %c0_17], %18 {strides = array<i32>} : memref<128x128xf32, #tpu.memory_space<vmem>>, vector<128x128xf32>,
    return
  }
}

</mosaic_0001>

<bundles_post_ra>
// kernel: _dqn_forward.1
= control target key start
LH: loop header
LB: loop body
LE: loop exit
PB: predicated region body
PF: predicated region fallthrough
CT: control target
= control target key end

     0   :  { %s773_s1 = inlined_call_operand.vmem [shape: f32[4,128,128], index: 1, kind: input, shape index: {}]   ;;  %s774_s0 = inlined_call_operand.vmem [shape: f32[128,128], index: 0, kind: input, shape index: {}]   ;;  %s775_s2 = inlined_call_operand.vmem [shape: f32[128,128], index: 2, kind: output, shape index: {}]  }
   0x1   :  { %v42_v0 = vld [vmem:[%s773_s1 + $0x78] sm:$0xff]  ;;  %v41_v1 = vld [vmem:[%s773_s1 + $0x70] sm:$0xff]  ;;  %v40_v2 = vld [vmem:[%s773_s1 + $0x68] sm:$0xff] }
   0x2   :  { %43 = vmatpush.msra.mxu0 %v42_v0  ;;  %v39_v3 = vld [vmem:[%s773_s1 + $0x60] sm:$0xff]  ;;  %v38_v4 = vld [vmem:[%s773_s1 + $0x58] sm:$0xff]  ;;  %v37_v5 = vld [vmem:[%s773_s1 + $0x50] sm:$0xff] }
   0x3   :  { %v36_v6 = vld [vmem:[%s773_s1 + $0x48] sm:$0xff]  ;;  %v35_v7 = vld [vmem:[%s773_s1 + $0x40] sm:$0xff]  ;;  %v34_v8 = vld [vmem:[%s773_s1 + $0x38] sm:$0xff] }
   0x4   :  { %44 = vmatpush.msra.mxu0 %v41_v1  ;;  %v33_v9 = vld [vmem:[%s773_s1 + $0x30] sm:$0xff]  ;;  %v32_v10 = vld [vmem:[%s773_s1 + $0x28] sm:$0xff]  ;;  %v31_v11 = vld [vmem:[%s773_s1 + $0x20] sm:$0xff] }
   0x5   :  { %v30_v12 = vld [vmem:[%s773_s1 + $0x18] sm:$0xff]  ;;  %v29_v13 = vld [vmem:[%s773_s1 + $0x10] sm:$0xff]  ;;  %v28_v14 = vld [vmem:[%s773_s1 + $0x8] sm:$0xff] }
   0x6   :  { %45 = vmatpush.msra.mxu0 %v40_v2  ;;  %v27_v15 = vld [vmem:[%s773_s1] sm:$0xff]  ;;  %v12_v17 = vld [vmem:[%s774_s0 + $0x8] sm:$0xff]  ;;  %v13_v18 = vld [vmem:[%s774_s0 + $0x10] sm:$0xff] }
   0x7   :  { %v11_v16 = vld [vmem:[%s774_s0] sm:$0xff]  ;;  %v14_v19 = vld [vmem:[%s774_s0 + $0x18] sm:$0xff]  ;;  %v16_v21 = vld [vmem:[%s774_s0 + $0x28] sm:$0xff] }
   0x8   :  { %46 = vmatpush.msra.mxu0 %v39_v3  ;;  %v15_v20 = vld [vmem:[%s774_s0 + $0x20] sm:$0xff]  ;;  %v17_v22 = vld [vmem:[%s774_s0 + $0x30] sm:$0xff]  ;;  %v18_v23 = vld [vmem:[%s774_s0 + $0x38] sm:$0xff] }
   0x9   :  { %v19_v24 = vld [vmem:[%s774_s0 + $0x40] sm:$0xff]  ;;  %v437_v25 = vld [vmem:[%s773_s1 + $0xf8] sm:$0xff]  ;;  %v436_v26 = vld [vmem:[%s773_s1 + $0xf0] sm:$0xff] }
   0xa   :  { %47 = vmatpush.msra.mxu0 %v38_v4  ;;  %141 = vmatpush.msra.mxu1 %v437_v25  ;;  %v435_v27 = vld [vmem:[%s773_s1 + $0xe8] sm:$0xff]  ;;  %v434_v28 = vld [vmem:[%s773_s1 + $0xe0] sm:$0xff]  ;;  %v433_v30 = vld [vmem:[%s773_s1 + $0xd8] sm:$0xff] }
   0xb   :  { %v20_v29 = vld [vmem:[%s774_s0 + $0x48] sm:$0xff]  ;;  %v432_v31 = vld [vmem:[%s773_s1 + $0xd0] sm:$0xff]  ;;  %v430_v33 = vld [vmem:[%s773_s1 + $0xc0] sm:$0xff] }
   0xc   :  { %48 = vmatpush.msra.mxu0 %v37_v5  ;;  %142 = vmatpush.msra.mxu1 %v436_v26  ;;  %v431_v32 = vld [vmem:[%s773_s1 + $0xc8] sm:$0xff]  ;;  %v21_v34 = vld [vmem:[%s774_s0 + $0x50] sm:$0xff]  ;;  %v429_v35 = vld [vmem:[%s773_s1 + $0xb8] sm:$0xff] }
   0xd   :  { %v428_v36 = vld [vmem:[%s773_s1 + $0xb0] sm:$0xff]  ;;  %v427_v37 = vld [vmem:[%s773_s1 + $0xa8] sm:$0xff]  ;;  %v426_v38 = vld [vmem:[%s773_s1 + $0xa0] sm:$0xff] }
   0xe   :  { %49 = vmatpush.msra.mxu0 %v36_v6  ;;  %143 = vmatpush.msra.mxu1 %v435_v27  ;;  %v22_v39 = vld [vmem:[%s774_s0 + $0x58] sm:$0xff]  ;;  %v424_v41 = vld [vmem:[%s773_s1 + $0x90] sm:$0xff]  ;;  %v423_v42 = vld [vmem:[%s773_s1 + $0x88] sm:$0xff] }
   0xf   :  { %v425_v40 = vld [vmem:[%s773_s1 + $0x98] sm:$0xff]  ;;  %v23_v43 = vld [vmem:[%s774_s0 + $0x60] sm:$0xff]  ;;  %v24_v45 = vld [vmem:[%s774_s0 + $0x68] sm:$0xff] }
  0x10   :  { %50 = vmatpush.msra.mxu0 %v35_v7  ;;  %144 = vmatpush.msra.mxu1 %v434_v28  ;;  %v422_v44 = vld [vmem:[%s773_s1 + $0x80] sm:$0xff]  ;;  %v25_v46 = vld [vmem:[%s774_s0 + $0x70] sm:$0xff]  ;;  %v26_v47 = vld [vmem:[%s774_s0 + $0x78] sm:$0xff] }
  0x11   :  { %v453_v2 = vld [vmem:[%s773_s1 + $0x178] sm:$0xff]  ;;  %v452_v3 = vld [vmem:[%s773_s1 + $0x170] sm:$0xff]  ;;  %v451_v4 = vld [vmem:[%s773_s1 + $0x168] sm:$0xff] }
  0x12   :  { %51 = vmatpush.msra.mxu0 %v34_v8  ;;  %145 = vmatpush.msra.mxu1 %v433_v30  ;;  %v450_v7 = vld [vmem:[%s773_s1 + $0x160] sm:$0xff]  ;;  %v449_v8 = vld [vmem:[%s773_s1 + $0x158] sm:$0xff] }
  0x13   :  { %239 = vmatpush.msra.mxu2 %v453_v2  ;;  %v438_v25 = vld [vmem:[%s773_s1 + $0x100] sm:$0xff]  ;;  %v459_v2 = vld [vmem:[%s773_s1 + $0x1a8] sm:$0xff] }
  0x14   :  { %52 = vmatpush.msra.mxu0 %v33_v9  ;;  %146 = vmatpush.msra.mxu1 %v432_v31  ;;  %v448_v9 = vld [vmem:[%s773_s1 + $0x150] sm:$0xff] }
  0x15   :  { %240 = vmatpush.msra.mxu2 %v452_v3  ;;  %v458_v3 = vld [vmem:[%s773_s1 + $0x1a0] sm:$0xff] }
  0x16   :  { %53 = vmatpush.msra.mxu0 %v32_v10  ;;  %147 = vmatpush.msra.mxu1 %v431_v32  ;;  %v447_v10 = vld [vmem:[%s773_s1 + $0x148] sm:$0xff] }
  0x17   :  { %241 = vmatpush.msra.mxu2 %v451_v4  ;;  %v457_v4 = vld [vmem:[%s773_s1 + $0x198] sm:$0xff] }
  0x18   :  { %54 = vmatpush.msra.mxu0 %v31_v11  ;;  %148 = vmatpush.msra.mxu1 %v430_v33 }
  0x19   :  { %242 = vmatpush.msra.mxu2 %v450_v7  ;;  %v456_v7 = vld [vmem:[%s773_s1 + $0x190] sm:$0xff] }
  0x1a   :  { %55 = vmatpush.msra.mxu0 %v30_v12  ;;  %149 = vmatpush.msra.mxu1 %v429_v35 }
  0x1b   :  { %243 = vmatpush.msra.mxu2 %v449_v8  ;;  %v455_v8 = vld [vmem:[%s773_s1 + $0x188] sm:$0xff] }
  0x1c   :  { %56 = vmatpush.msra.mxu0 %v29_v13  ;;  %150 = vmatpush.msra.mxu1 %v428_v36  ;;  %v446_v13 = vld [vmem:[%s773_s1 + $0x140] sm:$0xff] }
  0x1d   :  { %244 = vmatpush.msra.mxu2 %v448_v9  ;;  %v454_v9 = vld [vmem:[%s773_s1 + $0x180] sm:$0xff] }
  0x1e   :  { %57 = vmatpush.msra.mxu0 %v28_v14  ;;  %151 = vmatpush.msra.mxu1 %v427_v37  ;;  %v445_v14 = vld [vmem:[%s773_s1 + $0x138] sm:$0xff] }
  0x1f   :  { %245 = vmatpush.msra.mxu2 %v447_v10 }
  0x20   :  { %58 = vmatpush.msra.mxu0 %v27_v15  ;;  %152 = vmatpush.msra.mxu1 %v426_v38  ;;  %v444_v15 = vld [vmem:[%s773_s1 + $0x130] sm:$0xff] }
  0x21   :  { %59 = vmatmul.f32.vlgmr.msra.gmra.mxu0 %v11_v16  ;;  %246 = vmatpush.msra.mxu2 %v446_v13  ;;  %v443_v16 = vld [vmem:[%s773_s1 + $0x128] sm:$0xff] }
  0x22   :  { %153 = vmatpush.msra.mxu1 %v425_v40 }
  0x23   :  { %247 = vmatpush.msra.mxu2 %v445_v14 }
  0x24   :  { %154 = vmatpush.msra.mxu1 %v424_v41 }
  0x25   :  { %248 = vmatpush.msra.mxu2 %v444_v15 }
  0x26   :  { %155 = vmatpush.msra.mxu1 %v423_v42 }
  0x27   :  { %249 = vmatpush.msra.mxu2 %v443_v16 }
  0x28   :  { %156 = vmatpush.msra.mxu1 %v422_v44 }
  0x29   :  { %62 = vmatmul.f32.gmra.mxu0 %v12_v17 }
  0x31   :  { %65 = vmatmul.f32.gmra.mxu0 %v13_v18 }
  0x39   :  { %68 = vmatmul.f32.gmra.mxu0 %v14_v19  ;;  %v442_v19 = vld [vmem:[%s773_s1 + $0x120] sm:$0xff] }
  0x3a   :  { %250 = vmatpush.msra.mxu2 %v442_v19 }
  0x41   :  { %71 = vmatmul.f32.gmra.mxu0 %v15_v20  ;;  %v441_v20 = vld [vmem:[%s773_s1 + $0x118] sm:$0xff] }
  0x42   :  { %251 = vmatpush.msra.mxu2 %v441_v20 }
  0x49   :  { %74 = vmatmul.f32.gmra.mxu0 %v16_v21  ;;  %v440_v21 = vld [vmem:[%s773_s1 + $0x110] sm:$0xff] }
  0x4a   :  { %252 = vmatpush.msra.mxu2 %v440_v21 }
  0x51   :  { %77 = vmatmul.f32.gmra.mxu0 %v17_v22  ;;  %v439_v22 = vld [vmem:[%s773_s1 + $0x108] sm:$0xff] }
  0x52   :  { %253 = vmatpush.msra.mxu2 %v439_v22 }
  0x54   :  { %254 = vmatpush.msra.mxu2 %v438_v25 }
  0x59   :  { %80 = vmatmul.f32.gmra.mxu0 %v18_v23 }
  0x61   :  { %83 = vmatmul.f32.gmra.mxu0 %v19_v24 }
  0x69   :  { %86 = vmatmul.f32.gmra.mxu0 %v20_v29 }
  0x71   :  { %89 = vmatmul.f32.gmra.mxu0 %v21_v34 }
  0x79   :  { %92 = vmatmul.f32.gmra.mxu0 %v22_v39 }
  0x81   :  { %95 = vmatmul.f32.gmra.mxu0 %v23_v43 }
  0x89   :  { %98 = vmatmul.f32.gmra.mxu0 %v24_v45 }
  0x91   :  { %101 = vmatmul.f32.gmra.mxu0 %v25_v46 }
  0x99   :  { %104 = vmatmul.f32.gmra.mxu0 %v26_v47 }
  0x9e   :  { %v60_v48 = vpop.f32.mrf.mxu0 }
  0x9f   :  { %v108_v49 = vmax.f32 %v60_v48, 0.0 }
  0xa1   :  { %157 = vmatmul.f32.vlgmr.msra.gmra.mxu1 %v108_v49 }
  0xa6   :  { %v63_v50 = vpop.f32.mrf.mxu0 }
  0xa7   :  { %v109_v51 = vmax.f32 %v63_v50, 0.0 }
  0xa9   :  { %160 = vmatmul.f32.gmra.mxu1 %v109_v51 }
  0xae   :  { %v66_v52 = vpop.f32.mrf.mxu0 }
  0xaf   :  { %v110_v53 = vmax.f32 %v66_v52, 0.0  ;;  %v469_v52 = vld [vmem:[%s773_s1 + $0x1f8] sm:$0xff] }
  0xb0   :  { %337 = vmatpush.msra.mxu3 %v469_v52 }
  0xb1   :  { %163 = vmatmul.f32.gmra.mxu1 %v110_v53  ;;  %v468_v53 = vld [vmem:[%s773_s1 + $0x1f0] sm:$0xff] }
  0xb2   :  { %338 = vmatpush.msra.mxu3 %v468_v53 }
  0xb6   :  { %v69_v54 = vpop.f32.mrf.mxu0 }
  0xb7   :  { %v111_v55 = vmax.f32 %v69_v54, 0.0  ;;  %v467_v54 = vld [vmem:[%s773_s1 + $0x1e8] sm:$0xff] }
  0xb8   :  { %339 = vmatpush.msra.mxu3 %v467_v54 }
  0xb9   :  { %166 = vmatmul.f32.gmra.mxu1 %v111_v55  ;;  %v466_v55 = vld [vmem:[%s773_s1 + $0x1e0] sm:$0xff] }
  0xba   :  { %340 = vmatpush.msra.mxu3 %v466_v55 }
  0xbe   :  { %v72_v56 = vpop.f32.mrf.mxu0 }
  0xbf   :  { %v112_v57 = vmax.f32 %v72_v56, 0.0 }
  0xc1   :  { %169 = vmatmul.f32.gmra.mxu1 %v112_v57 }
  0xc6   :  { %v75_v58 = vpop.f32.mrf.mxu0 }
  0xc7   :  { %v113_v59 = vmax.f32 %v75_v58, 0.0  ;;  %v465_v58 = vld [vmem:[%s773_s1 + $0x1d8] sm:$0xff] }
  0xc8   :  { %341 = vmatpush.msra.mxu3 %v465_v58 }
  0xc9   :  { %172 = vmatmul.f32.gmra.mxu1 %v113_v59  ;;  %v464_v59 = vld [vmem:[%s773_s1 + $0x1d0] sm:$0xff] }
  0xca   :  { %342 = vmatpush.msra.mxu3 %v464_v59 }
  0xce   :  { %v78_v60 = vpop.f32.mrf.mxu0 }
  0xcf   :  { %v114_v61 = vmax.f32 %v78_v60, 0.0  ;;  %v463_v60 = vld [vmem:[%s773_s1 + $0x1c8] sm:$0xff] }
  0xd0   :  { %343 = vmatpush.msra.mxu3 %v463_v60 }
  0xd1   :  { %175 = vmatmul.f32.gmra.mxu1 %v114_v61  ;;  %v462_v61 = vld [vmem:[%s773_s1 + $0x1c0] sm:$0xff] }
  0xd2   :  { %344 = vmatpush.msra.mxu3 %v462_v61 }
  0xd6   :  { %v81_v62 = vpop.f32.mrf.mxu0 }
  0xd7   :  { %v115_v63 = vmax.f32 %v81_v62, 0.0 }
  0xd9   :  { %178 = vmatmul.f32.gmra.mxu1 %v115_v63 }
  0xde   :  { %v84_v0 = vpop.f32.mrf.mxu0 }
  0xdf   :  { %v116_v1 = vmax.f32 %v84_v0, 0.0  ;;  %v461_v0 = vld [vmem:[%s773_s1 + $0x1b8] sm:$0xff] }
  0xe0   :  { %345 = vmatpush.msra.mxu3 %v461_v0 }
  0xe1   :  { %181 = vmatmul.f32.gmra.mxu1 %v116_v1  ;;  %v460_v1 = vld [vmem:[%s773_s1 + $0x1b0] sm:$0xff] }
  0xe2   :  { %346 = vmatpush.msra.mxu3 %v460_v1 }
  0xe4   :  { %347 = vmatpush.msra.mxu3 %v459_v2 }
  0xe6   :  { %v87_v5 = vpop.f32.mrf.mxu0  ;;  %348 = vmatpush.msra.mxu3 %v458_v3 }
  0xe7   :  { %v117_v6 = vmax.f32 %v87_v5, 0.0 }
  0xe8   :  { %349 = vmatpush.msra.mxu3 %v457_v4 }
  0xe9   :  { %184 = vmatmul.f32.gmra.mxu1 %v117_v6 }
  0xea   :  { %350 = vmatpush.msra.mxu3 %v456_v7 }
  0xec   :  { %351 = vmatpush.msra.mxu3 %v455_v8 }
  0xee   :  { %v90_v11 = vpop.f32.mrf.mxu0  ;;  %352 = vmatpush.msra.mxu3 %v454_v9 }
  0xef   :  { %v118_v12 = vmax.f32 %v90_v11, 0.0 }
  0xf1   :  { %187 = vmatmul.f32.gmra.mxu1 %v118_v12 }
  0xf6   :  { %v93_v17 = vpop.f32.mrf.mxu0 }
  0xf7   :  { %v119_v18 = vmax.f32 %v93_v17, 0.0 }
  0xf9   :  { %190 = vmatmul.f32.gmra.mxu1 %v119_v18 }
  0xfe   :  { %v96_v23 = vpop.f32.mrf.mxu0 }
  0xff   :  { %v120_v24 = vmax.f32 %v96_v23, 0.0 }
 0x101   :  { %193 = vmatmul.f32.gmra.mxu1 %v120_v24 }
 0x106   :  { %v99_v26 = vpop.f32.mrf.mxu0 }
 0x107   :  { %v121_v27 = vmax.f32 %v99_v26, 0.0 }
 0x109   :  { %196 = vmatmul.f32.gmra.mxu1 %v121_v27 }
 0x10e   :  { %v102_v28 = vpop.f32.mrf.mxu0 }
 0x10f   :  { %v122_v29 = vmax.f32 %v102_v28, 0.0 }
 0x111   :  { %199 = vmatmul.f32.gmra.mxu1 %v122_v29 }
 0x116   :  { %v105_v30 = vpop.f32.mrf.mxu0 }
 0x117   :  { %v123_v31 = vmax.f32 %v105_v30, 0.0 }
 0x119   :  { %202 = vmatmul.f32.gmra.mxu1 %v123_v31 }
 0x11e   :  { %v158_v32 = vpop.f32.mrf.mxu1 }
 0x11f   :  { %v206_v33 = vmax.f32 %v158_v32, 0.0 }
 0x121   :  { %255 = vmatmul.f32.vlgmr.msra.gmra.mxu2 %v206_v33 }
 0x126   :  { %v161_v34 = vpop.f32.mrf.mxu1 }
 0x127   :  { %v207_v35 = vmax.f32 %v161_v34, 0.0 }
 0x129   :  { %258 = vmatmul.f32.gmra.mxu2 %v207_v35 }
 0x12e   :  { %v164_v36 = vpop.f32.mrf.mxu1 }
 0x12f   :  { %v208_v37 = vmax.f32 %v164_v36, 0.0 }
 0x131   :  { %261 = vmatmul.f32.gmra.mxu2 %v208_v37 }
 0x136   :  { %v167_v38 = vpop.f32.mrf.mxu1 }
 0x137   :  { %v209_v39 = vmax.f32 %v167_v38, 0.0 }
 0x139   :  { %264 = vmatmul.f32.gmra.mxu2 %v209_v39 }
 0x13e   :  { %v170_v40 = vpop.f32.mrf.mxu1 }
 0x13f   :  { %v210_v41 = vmax.f32 %v170_v40, 0.0 }
 0x141   :  { %267 = vmatmul.f32.gmra.mxu2 %v210_v41 }
 0x146   :  { %v173_v42 = vpop.f32.mrf.mxu1 }
 0x147   :  { %v211_v43 = vmax.f32 %v173_v42, 0.0 }
 0x149   :  { %270 = vmatmul.f32.gmra.mxu2 %v211_v43 }
 0x14e   :  { %v176_v44 = vpop.f32.mrf.mxu1 }
 0x14f   :  { %v212_v45 = vmax.f32 %v176_v44, 0.0 }
 0x151   :  { %273 = vmatmul.f32.gmra.mxu2 %v212_v45 }
 0x156   :  { %v179_v46 = vpop.f32.mrf.mxu1 }
 0x157   :  { %v213_v47 = vmax.f32 %v179_v46, 0.0 }
 0x159   :  { %276 = vmatmul.f32.gmra.mxu2 %v213_v47 }
 0x15e   :  { %v182_v48 = vpop.f32.mrf.mxu1 }
 0x15f   :  { %v214_v49 = vmax.f32 %v182_v48, 0.0 }
 0x161   :  { %279 = vmatmul.f32.gmra.mxu2 %v214_v49 }
 0x166   :  { %v185_v50 = vpop.f32.mrf.mxu1 }
 0x167   :  { %v215_v51 = vmax.f32 %v185_v50, 0.0 }
 0x169   :  { %282 = vmatmul.f32.gmra.mxu2 %v215_v51 }
 0x16e   :  { %v188_v56 = vpop.f32.mrf.mxu1 }
 0x16f   :  { %v216_v57 = vmax.f32 %v188_v56, 0.0 }
 0x171   :  { %285 = vmatmul.f32.gmra.mxu2 %v216_v57 }
 0x176   :  { %v191_v62 = vpop.f32.mrf.mxu1 }
 0x177   :  { %v217_v63 = vmax.f32 %v191_v62, 0.0 }
 0x179   :  { %288 = vmatmul.f32.gmra.mxu2 %v217_v63 }
 0x17e   :  { %v194_v5 = vpop.f32.mrf.mxu1 }
 0x17f   :  { %v218_v6 = vmax.f32 %v194_v5, 0.0 }
 0x181   :  { %291 = vmatmul.f32.gmra.mxu2 %v218_v6 }
 0x186   :  { %v197_v10 = vpop.f32.mrf.mxu1 }
 0x187   :  { %v219_v11 = vmax.f32 %v197_v10, 0.0 }
 0x189   :  { %294 = vmatmul.f32.gmra.mxu2 %v219_v11 }
 0x18e   :  { %v200_v12 = vpop.f32.mrf.mxu1 }
 0x18f   :  { %v220_v13 = vmax.f32 %v200_v12, 0.0 }
 0x191   :  { %297 = vmatmul.f32.gmra.mxu2 %v220_v13 }
 0x196   :  { %v203_v14 = vpop.f32.mrf.mxu1 }
 0x197   :  { %v221_v15 = vmax.f32 %v203_v14, 0.0 }
 0x199   :  { %300 = vmatmul.f32.gmra.mxu2 %v221_v15 }
 0x1a4   :  { %v256_v16 = vpop.f32.mrf.mxu2 }
 0x1a5   :  { %v304_v17 = vmax.f32 %v256_v16, 0.0 }
 0x1a7   :  { %353 = vmatmul.f32.vlgmr.msra.gmra.mxu3 %v304_v17 }
 0x1ac   :  { %v259_v18 = vpop.f32.mrf.mxu2 }
 0x1ad   :  { %v305_v19 = vmax.f32 %v259_v18, 0.0 }
 0x1af   :  { %356 = vmatmul.f32.gmra.mxu3 %v305_v19 }
 0x1b4   :  { %v262_v20 = vpop.f32.mrf.mxu2 }
 0x1b5   :  { %v306_v21 = vmax.f32 %v262_v20, 0.0 }
 0x1b7   :  { %359 = vmatmul.f32.gmra.mxu3 %v306_v21 }
 0x1bc   :  { %v265_v22 = vpop.f32.mrf.mxu2 }
 0x1bd   :  { %v307_v23 = vmax.f32 %v265_v22, 0.0 }
 0x1bf   :  { %362 = vmatmul.f32.gmra.mxu3 %v307_v23 }
 0x1c4   :  { %v268_v24 = vpop.f32.mrf.mxu2 }
 0x1c5   :  { %v308_v25 = vmax.f32 %v268_v24, 0.0 }
 0x1c7   :  { %365 = vmatmul.f32.gmra.mxu3 %v308_v25 }
 0x1cc   :  { %v271_v26 = vpop.f32.mrf.mxu2 }
 0x1cd   :  { %v309_v27 = vmax.f32 %v271_v26, 0.0 }
 0x1cf   :  { %368 = vmatmul.f32.gmra.mxu3 %v309_v27 }
 0x1d4   :  { %v274_v28 = vpop.f32.mrf.mxu2 }
 0x1d5   :  { %v310_v29 = vmax.f32 %v274_v28, 0.0 }
 0x1d7   :  { %371 = vmatmul.f32.gmra.mxu3 %v310_v29 }
 0x1dc   :  { %v277_v30 = vpop.f32.mrf.mxu2 }
 0x1dd   :  { %v311_v31 = vmax.f32 %v277_v30, 0.0 }
 0x1df   :  { %374 = vmatmul.f32.gmra.mxu3 %v311_v31 }
 0x1e4   :  { %v280_v32 = vpop.f32.mrf.mxu2 }
 0x1e5   :  { %v312_v33 = vmax.f32 %v280_v32, 0.0 }
 0x1e7   :  { %377 = vmatmul.f32.gmra.mxu3 %v312_v33 }
 0x1ec   :  { %v283_v34 = vpop.f32.mrf.mxu2 }
 0x1ed   :  { %v313_v35 = vmax.f32 %v283_v34, 0.0 }
 0x1ef   :  { %380 = vmatmul.f32.gmra.mxu3 %v313_v35 }
 0x1f4   :  { %v286_v36 = vpop.f32.mrf.mxu2 }
 0x1f5   :  { %v314_v37 = vmax.f32 %v286_v36, 0.0 }
 0x1f7   :  { %383 = vmatmul.f32.gmra.mxu3 %v314_v37 }
 0x1fc   :  { %v289_v38 = vpop.f32.mrf.mxu2 }
 0x1fd   :  { %v315_v39 = vmax.f32 %v289_v38, 0.0 }
 0x1ff   :  { %386 = vmatmul.f32.gmra.mxu3 %v315_v39 }
 0x204   :  { %v292_v40 = vpop.f32.mrf.mxu2 }
 0x205   :  { %v316_v41 = vmax.f32 %v292_v40, 0.0 }
 0x207   :  { %389 = vmatmul.f32.gmra.mxu3 %v316_v41 }
 0x20c   :  { %v295_v42 = vpop.f32.mrf.mxu2 }
 0x20d   :  { %v317_v43 = vmax.f32 %v295_v42, 0.0 }
 0x20f   :  { %392 = vmatmul.f32.gmra.mxu3 %v317_v43 }
 0x214   :  { %v298_v44 = vpop.f32.mrf.mxu2 }
 0x215   :  { %v318_v45 = vmax.f32 %v298_v44, 0.0 }
 0x217   :  { %395 = vmatmul.f32.gmra.mxu3 %v318_v45 }
 0x21c   :  { %v301_v46 = vpop.f32.mrf.mxu2 }
 0x21d   :  { %v319_v47 = vmax.f32 %v301_v46, 0.0 }
 0x21f   :  { %398 = vmatmul.f32.gmra.mxu3 %v319_v47 }
 0x22a   :  { %v354_v48 = vpop.f32.mrf.mxu3 }
 0x22b   :  { %402 = vst [vmem:[%s775_s2] sm:$0xff] %v354_v48 }
 0x232   :  { %v357_v49 = vpop.f32.mrf.mxu3 }
 0x233   :  { %403 = vst [vmem:[%s775_s2 + $0x8] sm:$0xff] %v357_v49 }
 0x23a   :  { %v360_v50 = vpop.f32.mrf.mxu3 }
 0x23b   :  { %404 = vst [vmem:[%s775_s2 + $0x10] sm:$0xff] %v360_v50 }
 0x242   :  { %v363_v51 = vpop.f32.mrf.mxu3 }
 0x243   :  { %405 = vst [vmem:[%s775_s2 + $0x18] sm:$0xff] %v363_v51 }
 0x24a   :  { %v366_v52 = vpop.f32.mrf.mxu3 }
 0x24b   :  { %406 = vst [vmem:[%s775_s2 + $0x20] sm:$0xff] %v366_v52 }
 0x252   :  { %v369_v53 = vpop.f32.mrf.mxu3 }
 0x253   :  { %407 = vst [vmem:[%s775_s2 + $0x28] sm:$0xff] %v369_v53 }
 0x25a   :  { %v372_v54 = vpop.f32.mrf.mxu3 }
 0x25b   :  { %408 = vst [vmem:[%s775_s2 + $0x30] sm:$0xff] %v372_v54 }
 0x262   :  { %v375_v55 = vpop.f32.mrf.mxu3 }
 0x263   :  { %409 = vst [vmem:[%s775_s2 + $0x38] sm:$0xff] %v375_v55 }
 0x26a   :  { %v378_v56 = vpop.f32.mrf.mxu3 }
 0x26b   :  { %410 = vst [vmem:[%s775_s2 + $0x40] sm:$0xff] %v378_v56 }
 0x272   :  { %v381_v57 = vpop.f32.mrf.mxu3 }
 0x273   :  { %411 = vst [vmem:[%s775_s2 + $0x48] sm:$0xff] %v381_v57 }
 0x27a   :  { %v384_v58 = vpop.f32.mrf.mxu3 }
 0x27b   :  { %412 = vst [vmem:[%s775_s2 + $0x50] sm:$0xff] %v384_v58 }
 0x282   :  { %v387_v59 = vpop.f32.mrf.mxu3 }
 0x283   :  { %413 = vst [vmem:[%s775_s2 + $0x58] sm:$0xff] %v387_v59 }
 0x28a   :  { %v390_v60 = vpop.f32.mrf.mxu3 }
 0x28b   :  { %414 = vst [vmem:[%s775_s2 + $0x60] sm:$0xff] %v390_v60 }
 0x292   :  { %v393_v61 = vpop.f32.mrf.mxu3 }
 0x293   :  { %415 = vst [vmem:[%s775_s2 + $0x68] sm:$0xff] %v393_v61 }
 0x29a   :  { %v396_v62 = vpop.f32.mrf.mxu3 }
 0x29b   :  { %416 = vst [vmem:[%s775_s2 + $0x70] sm:$0xff] %v396_v62 }
 0x2a2   :  { %v399_v63 = vpop.f32.mrf.mxu3 }
 0x2a3   :  { %417 = vst [vmem:[%s775_s2 + $0x78] sm:$0xff] %v399_v63 }

</bundles_post_ra>
